<compile_context>
chip_gen: v5e
topology: v5e:2x2
jax: 0.10.0
libtpu: 0.0.40
codegen_flags: <defaults>
</compile_context>

<pallas_src>
import functools

import jax
import jax.numpy as jnp
from jax.experimental import pallas as pl
from jax.experimental.pallas import tpu as pltpu


# ----------------------------------------------------------------------------
# Kernel 1: fused channel pass (1x1-conv reduce + mean + max) and batch softmax
# Operates lane-dense on (B, C, HW).
# ----------------------------------------------------------------------------
def spa_stats_kernel(x_ref, wm_ref, bm_ref, avg_ref, mx_ref, cm_ref):
    x = x_ref[...]                               # (B, C, HW), read once
    C = x.shape[1]

    x0 = x[:, 0, :]
    wsum = wm_ref[0] * x0                        # 1x1-conv weighted sum
    csum = x0                                    # running sum   (for mean)
    cmax = x0                                    # running max
    for c in range(1, C):
        xc = x[:, c, :]
        wsum = wsum + wm_ref[c] * xc
        csum = csum + xc
        cmax = jnp.maximum(cmax, xc)
    cm_raw = wsum + bm_ref[0]                    # (B, HW)

    # nn.Softmax() on a (B, 1, H*W) view -> torch picks dim=0 (across batch).
    m = jnp.max(cm_raw, axis=0, keepdims=True)
    e = jnp.exp(cm_raw - m)
    denom = jnp.sum(e, axis=0, keepdims=True)
    cm_ref[...] = e * pl.reciprocal(denom, approx=True)

    avg_ref[...] = csum * (1.0 / C)
    mx_ref[...] = cmax


# ----------------------------------------------------------------------------
# Kernel 2: fused batched matmul  [avg; max] (B, 2H, H)  @  mask (B, H, W)
# ----------------------------------------------------------------------------
def spa_matmul_kernel(a_ref, cm_ref, prod_ref):
    prod_ref[...] = jnp.einsum(
        'bij,bjk->bik', a_ref[...], cm_ref[...],
        preferred_element_type=jnp.float32)


# ----------------------------------------------------------------------------
# Kernel 3: 7x7 conv (2 -> 1, pad 3) via roll+mask taps, sigmoid, and the
# final lane-dense multiply with x.  Operates on flattened (B, HW) slabs.
# ----------------------------------------------------------------------------
def spa_conv_mul_kernel(prod_ref, x_ref, wc_ref, bc_ref, out_ref, *, H, W):
    HW = H * W
    B = prod_ref.shape[0]

    p = prod_ref[...]                            # (B, 2, HW)
    oa = p[:, 0, :]                              # matmul output, avg channel
    om = p[:, 1, :]                              # matmul output, max channel

    lane = jax.lax.broadcasted_iota(jnp.int32, (B, HW), 1)
    col = lane % W
    row = lane // W

    acc = jnp.zeros((B, HW), jnp.float32) + bc_ref[0]
    for ci, base in enumerate((oa, om)):
        # Horizontal taps, reused across all dy:
        #   hs[dx][b, l] = base[b, l + (dx-3)] if the column stays in range
        #   (pltpu.roll follows jnp.roll semantics; wrapped lanes are masked).
        hs = []
        for dx in range(7):
            ox = dx - 3
            if ox == 0:
                hs.append(base)
            else:
                rolled = pltpu.roll(base, shift=(-ox) % HW, axis=1)
                valid = (col + ox >= 0) & (col + ox < W)
                hs.append(jnp.where(valid, rolled, 0.0))
        # Per dy: 7-tap weighted row sum, then vertical shift + mask.
        for dy in range(7):
            oy = dy - 3
            rowsum = wc_ref[ci * 49 + dy * 7] * hs[0]
            for dx in range(1, 7):
                rowsum = rowsum + wc_ref[ci * 49 + dy * 7 + dx] * hs[dx]
            if oy == 0:
                acc = acc + rowsum
            else:
                rolled = pltpu.roll(rowsum, shift=(-oy * W) % HW, axis=1)
                valid = (row + oy >= 0) & (row + oy < H)
                acc = acc + jnp.where(valid, rolled, 0.0)

    s = jax.nn.sigmoid(acc)                      # (B, HW)
    # Broadcast the single attention channel over C; lane-dense store.
    out_ref[...] = (s[:, None, :] * x_ref[...]).astype(out_ref.dtype)


# ----------------------------------------------------------------------------
# Wrapper
# ----------------------------------------------------------------------------
def spa_pallas(x, wm, bm, wc, bc):
    B, C, H, W = x.shape
    assert H == W, "torch.matmul on (H,W)@(H,W) requires square spatial dims"
    HW = H * W
    xf = x.reshape(B, C, HW)

    vmem = pl.BlockSpec(memory_space=pltpu.MemorySpace.VMEM)
    smem = pl.BlockSpec(memory_space=pltpu.MemorySpace.SMEM)

    # 1) lane-dense fused channel pass + batch softmax
    avg, mx, cm = pl.pallas_call(
        spa_stats_kernel,
        out_shape=(jax.ShapeDtypeStruct((B, HW), jnp.float32),
                   jax.ShapeDtypeStruct((B, HW), jnp.float32),
                   jax.ShapeDtypeStruct((B, HW), jnp.float32)),
        in_specs=[vmem, smem, smem],
        out_specs=(vmem, vmem, vmem),
    )(xf, wm, bm)

    # 2) fused batched matmul on 2-D views (reshapes done at the XLA level)
    a2d = jnp.concatenate([avg, mx], axis=1).reshape(B, 2 * H, W)
    cm2d = cm.reshape(B, H, W)
    prod = pl.pallas_call(
        spa_matmul_kernel,
        out_shape=jax.ShapeDtypeStruct((B, 2 * H, W), jnp.float32),
        in_specs=[vmem, vmem],
        out_specs=vmem,
    )(a2d, cm2d)

    # 3) roll-based 7x7 conv + sigmoid + lane-dense multiply with x
    prod_f = prod.reshape(B, 2, HW)
    outf = pl.pallas_call(
        functools.partial(spa_conv_mul_kernel, H=H, W=W),
        out_shape=jax.ShapeDtypeStruct((B, C, HW), jnp.float32),
        in_specs=[vmem, vmem, smem, smem],
        out_specs=vmem,
    )(prod_f, xf, wc.reshape(-1), bc)

    return outf.reshape(B, C, H, W)


# ----------------------------------------------------------------------------
# Pure-JAX mirror of the PyTorch forward, for validation.
# ----------------------------------------------------------------------------
def spa_reference(x, wm, bm, wc, bc):
    B, C, H, W = x.shape
    cm_raw = jnp.einsum('bchw,c->bhw', x, wm) + bm[0]
    cm = jax.nn.softmax(cm_raw, axis=0)              # nn.Softmax() -> dim=0
    avg = jnp.mean(x, axis=1)
    mx = jnp.max(x, axis=1)
    out_avg = jnp.einsum('bhk,bkw->bhw', avg, cm)
    out_max = jnp.einsum('bhk,bkw->bhw', mx, cm)
    out2 = jnp.stack([out_avg, out_max], axis=1)     # (B, 2, H, W)
    padded = jnp.pad(out2, ((0, 0), (0, 0), (3, 3), (3, 3)))
    conv = jnp.zeros((B, H, W), jnp.float32) + bc[0]
    for ci in range(2):
        for dy in range(7):
            for dx in range(7):
                conv = conv + wc[ci, dy, dx] * padded[:, ci, dy:dy + H, dx:dx + W]
    s = jax.nn.sigmoid(conv)
    return s[:, None, :, :] * x


if __name__ == "__main__":
    B, C, H, W = 2, 4, 16, 16
    key = jax.random.PRNGKey(0)
    kx, k1, k2, k3, k4 = jax.random.split(key, 5)

    x = jax.random.normal(kx, (B, C, H, W), jnp.float32)

    # conv_mask = Conv2d(C, 1, 1): weight (1, C, 1, 1) -> (C,), bias (1,)
    wm = 0.1 * jax.random.normal(k1, (C,), jnp.float32)
    bm = 0.1 * jax.random.normal(k2, (1,), jnp.float32)
    # conv = Conv2d(2, 1, 7, padding=3): weight (1, 2, 7, 7) -> (2, 7, 7), bias (1,)
    wc = 0.1 * jax.random.normal(k3, (2, 7, 7), jnp.float32)
    bc = 0.1 * jax.random.normal(k4, (1,), jnp.float32)

    out = spa_pallas(x, wm, bm, wc, bc)
    out = jax.block_until_ready(out)

    ref = spa_reference(x, wm, bm, wc, bc)
    assert out.shape == (B, C, H, W)
    assert jnp.allclose(out, ref, atol=2e-3, rtol=2e-3), (
        f"max abs diff {jnp.max(jnp.abs(out - ref))}")

    print("KERNEL_OK")
</pallas_src>

<mosaic_0001>
module attributes {stable_mosaic.version = 11 : i64} {
  func.func @spa_stats_kernel(%arg0: memref<2x4x256xf32, #tpu.memory_space<vmem>>, %arg1: memref<4xf32, #tpu.memory_space<smem>>, %arg2: memref<1xf32, #tpu.memory_space<smem>>, %arg3: memref<2x256xf32, #tpu.memory_space<vmem>>, %arg4: memref<2x256xf32, #tpu.memory_space<vmem>>, %arg5: memref<2x256xf32, #tpu.memory_space<vmem>>) attributes {dimension_semantics = [], scalar_prefetch = 0 : i64, scratch_operands = 0 : i64, tpu.core_type = #tpu.core_type<tc>} {
    %c0 = arith.constant 0 : index
    %c0_0 = arith.constant 0 : index
    %c0_1 = arith.constant 0 : index
    %0 = vector.load %arg0[%c0, %c0_0, %c0_1] : memref<2x4x256xf32, #tpu.memory_space<vmem>>, vector<2x4x256xf32>
    %1 = vector.extract_strided_slice %0 {offsets = [0, 0, 0], sizes = [2, 1, 256], strides = [1, 1, 1]} : vector<2x4x256xf32> to vector<2x1x256xf32>
    %2 = vector.shape_cast %1 : vector<2x1x256xf32> to vector<2x256xf32>
    %c0_2 = arith.constant 0 : index
    %3 = memref.load %arg1[%c0_2] : memref<4xf32, #tpu.memory_space<smem>>
    %4 = vector.broadcast %3 : f32 to vector<2x256xf32>
    %5 = arith.mulf %4, %2 : vector<2x256xf32>
    %6 = vector.extract_strided_slice %0 {offsets = [0, 1, 0], sizes = [2, 1, 256], strides = [1, 1, 1]} : vector<2x4x256xf32> to vector<2x1x256xf32>
    %7 = vector.shape_cast %6 : vector<2x1x256xf32> to vector<2x256xf32>
    %c1 = arith.constant 1 : index
    %8 = memref.load %arg1[%c1] : memref<4xf32, #tpu.memory_space<smem>>
    %9 = vector.broadcast %8 : f32 to vector<2x256xf32>
    %10 = arith.mulf %9, %7 : vector<2x256xf32>
    %11 = arith.addf %5, %10 : vector<2x256xf32>
    %12 = arith.addf %2, %7 : vector<2x256xf32>
    %13 = arith.maximumf %2, %7 : vector<2x256xf32>
    %14 = vector.extract_strided_slice %0 {offsets = [0, 2, 0], sizes = [2, 1, 256], strides = [1, 1, 1]} : vector<2x4x256xf32> to vector<2x1x256xf32>
    %15 = vector.shape_cast %14 : vector<2x1x256xf32> to vector<2x256xf32>
    %c2 = arith.constant 2 : index
    %16 = memref.load %arg1[%c2] : memref<4xf32, #tpu.memory_space<smem>>
    %17 = vector.broadcast %16 : f32 to vector<2x256xf32>
    %18 = arith.mulf %17, %15 : vector<2x256xf32>
    %19 = arith.addf %11, %18 : vector<2x256xf32>
    %20 = arith.addf %12, %15 : vector<2x256xf32>
    %21 = arith.maximumf %13, %15 : vector<2x256xf32>
    %22 = vector.extract_strided_slice %0 {offsets = [0, 3, 0], sizes = [2, 1, 256], strides = [1, 1, 1]} : vector<2x4x256xf32> to vector<2x1x256xf32>
    %23 = vector.shape_cast %22 : vector<2x1x256xf32> to vector<2x256xf32>
    %c3 = arith.constant 3 : index
    %24 = memref.load %arg1[%c3] : memref<4xf32, #tpu.memory_space<smem>>
    %25 = vector.broadcast %24 : f32 to vector<2x256xf32>
    %26 = arith.mulf %25, %23 : vector<2x256xf32>
    %27 = arith.addf %19, %26 : vector<2x256xf32>
    %28 = arith.addf %20, %23 : vector<2x256xf32>
    %29 = arith.maximumf %21, %23 : vector<2x256xf32>
    %c0_3 = arith.constant 0 : index
    %30 = memref.load %arg2[%c0_3] : memref<1xf32, #tpu.memory_space<smem>>
    %31 = vector.broadcast %30 : f32 to vector<2x256xf32>
    %32 = arith.addf %27, %31 : vector<2x256xf32>
    %cst = arith.constant dense<0xFF800000> : vector<256xf32>
    %33 = vector.multi_reduction <maximumf>, %32, %cst [0] : vector<2x256xf32> to vector<256xf32>
    %34 = vector.shape_cast %33 : vector<256xf32> to vector<1x256xf32>
    %35 = vector.broadcast %34 : vector<1x256xf32> to vector<2x256xf32>
    %36 = arith.subf %32, %35 : vector<2x256xf32>
    %37 = math.exp %36 : vector<2x256xf32>
    %cst_4 = arith.constant dense<0.000000e+00> : vector<256xf32>
    %38 = vector.multi_reduction <add>, %37, %cst_4 [0] : vector<2x256xf32> to vector<256xf32>
    %39 = vector.shape_cast %38 : vector<256xf32> to vector<1x256xf32>
    %40 = tpu.reciprocal %39 {approx = true} : vector<1x256xf32> -> vector<1x256xf32>
    %41 = vector.broadcast %40 : vector<1x256xf32> to vector<2x256xf32>
    %42 = arith.mulf %37, %41 : vector<2x256xf32>
    %c0_5 = arith.constant 0 : index
    %c0_6 = arith.constant 0 : index
    %43 = vector.load %arg5[%c0_5, %c0_6] : memref<2x256xf32, #tpu.memory_space<vmem>>, vector<2x256xf32>
    tpu.vector_store %arg5[%c0_5, %c0_6], %42 {strides = array<i32>} : memref<2x256xf32, #tpu.memory_space<vmem>>, vector<2x256xf32>,
    %cst_7 = arith.constant 2.500000e-01 : f32
    %44 = vector.broadcast %cst_7 : f32 to vector<2x256xf32>
    %45 = arith.mulf %28, %44 : vector<2x256xf32>
    %c0_8 = arith.constant 0 : index
    %c0_9 = arith.constant 0 : index
    %46 = vector.load %arg3[%c0_8, %c0_9] : memref<2x256xf32, #tpu.memory_space<vmem>>, vector<2x256xf32>
    tpu.vector_store %arg3[%c0_8, %c0_9], %45 {strides = array<i32>} : memref<2x256xf32, #tpu.memory_space<vmem>>, vector<2x256xf32>,
    %c0_10 = arith.constant 0 : index
    %c0_11 = arith.constant 0 : index
    %47 = vector.load %arg4[%c0_10, %c0_11] : memref<2x256xf32, #tpu.memory_space<vmem>>, vector<2x256xf32>
    tpu.vector_store %arg4[%c0_10, %c0_11], %29 {strides = array<i32>} : memref<2x256xf32, #tpu.memory_space<vmem>>, vector<2x256xf32>,
    return
  }
}

</mosaic_0001>

<bundles_post_ra>
// kernel: tpu_custom_call.1
= control target key start
LH: loop header
LB: loop body
LE: loop exit
PB: predicated region body
PF: predicated region fallthrough
CT: control target
= control target key end

     0   :  { %12 = vsyncpa [#allocation4], 0  ;;  %s565_s0 = inlined_call_operand.hbm [shape: f32[2,4,256], index: 0, kind: input, shape index: {}]   ;;  %s566_s1 = inlined_call_operand.vmem [shape: f32[4], index: 1, kind: input, shape index: {}]   ;;  %s567_s2 = inlined_call_operand.<no memory space> [shape: f32[1], index: 2, kind: input, shape index: {}]   ;;  %s568_s3 = inlined_call_operand.hbm [shape: f32[2,256], index: 3, kind: output, shape index: {0}]   ;;  %s569_s4 = inlined_call_operand.hbm [shape: f32[2,256], index: 4, kind: output, shape index: {1}]   ;;  %s570_s5 = inlined_call_operand.hbm [shape: f32[2,256], index: 5, kind: output, shape index: {2}]  }
   0x1   :  { %13 = vsyncpa [#allocation6], 0 }
   0x2   :  { %14 = vsyncpa [#allocation5], 0 }
   0x3   :  { %15 = vsyncpa [#allocation10], 0  ;;  %s20_s20 = sshll.u32 %s565_s0, 4  ;;  %s439_s21 = smov [#allocation3]   ;;  %s21_s20 = int_to_ptr.hbm [resolvable:$true] %s20_s20 }
   0x4   :  { %s22_s22 = sshll.u32 %s439_s21, 4  ;;  %s34_s25 = sshll.u32 %s566_s1, 4  ;;  %s23_s22 = int_to_ptr.vmem [resolvable:$true] %s22_s22  ;;  %s35_s25 = int_to_ptr.vmem [resolvable:$true] %s34_s25 }
   0x5   :  { %s440_s26 = smov 128   ;;  %s441_s27 = smov 8  }
   0x6   :  { %28 = dma.hbm_to_vmem [thread:$0]  %s21_s20, 256, %s23_s22, [#allocation4], %s440_s26, %s440_s26, %s441_s27  }
   0x7   :  { %s442_s28 = smov [#allocation7]  }
   0x8   :  { %37 = dma.vmem_to_smem %s35_s25, 16, %s442_s28, [#allocation6]  }
   0x9   :  { %431 = dma.done.wait [#allocation4], 256  }
   0xa   :  { %432 = vsyncadd [#allocation4], 4294967040 }
   0xb   :  { %433 = dma.done.wait [#allocation6], 16  }
   0xc   :  { %434 = vsyncadd [#allocation6], 4294967280 }
   0xd   :  { %48 = sfence }
   0xe   :  { %v482_v0 = vld [vmem:[#allocation3] sm:$0xff]  ;;  %v484_v1 = vld [vmem:[#allocation3 + $0x8] sm:$0xff]  ;;  %s51_s0 = sld [smem:[#allocation7]]  ;;  %vm166_vm0 = vcmask 1041409   ;;  %vm171_vm1 = vcmask 1041408   ;;  %vm210_vm2 = vcmask 1043459   ;;  %v130_v49 = vstv %s567_s2 }
   0xf   :  { %v71_v2 = vrot.slane %v482_v0, 5  ;;  %v73_v3 = vrot.slane %v484_v1, 5  ;;  %v95_v4 = vrot.slane %v482_v0, 6  ;;  %v97_v5 = vrot.slane %v484_v1, 6  ;;  %s299_s1 = sld [smem:[#allocation7 + $0x1]]  ;;  %s443_s6 = smov [#allocation9]  }
  0x10   :  { %v119_v6 = vrot.slane %v482_v0, 7  ;;  %v121_v7 = vrot.slane %v484_v1, 7  ;;  %s302_s29 = sld [smem:[#allocation7 + $0x2]]  ;;  %vm212_vm3 = vcmask 1045509   ;;  %vm214_vm4 = vcmask 1047559   ;;  %s266_s7 = sshll.u32 %s443_s6, 4  ;;  %s267_s7 = int_to_ptr.vmem [resolvable:$true] %s266_s7 }
  0x11   :  { %v492_v8 = vrot.slane %v71_v2, 4  ;;  %v494_v9 = vrot.slane %v73_v3, 4  ;;  %v496_v10 = vrot.slane %v95_v4, 4  ;;  %v498_v11 = vrot.slane %v97_v5, 4  ;;  %s305_s30 = sld [smem:[#allocation7 + $0x3]]  ;;  %s268_s10 = sshll.u32 %s569_s4, 4  ;;  %s269_s10 = int_to_ptr.hbm [resolvable:$true] %s268_s10 }
  0x12   :  { %v504_v14 = vrot.slane %v119_v6, 4  ;;  %v506_v15 = vrot.slane %v121_v7, 4  ;;  %vm133_vm5 = vcmask 1040384   ;;  %vm134_vm6 = vcmask 1044484   ;;  %s444_s2 = smov [#allocation8]   ;;  %s257_s15 = sshll.u32 %s568_s3, 4  ;;  %s258_s15 = int_to_ptr.hbm [resolvable:$true] %s257_s15 }
  0x13   :  { %v79_v12 = vmax.f32 %v482_v0, %v492_v8  ;;  %v80_v13 = vmax.f32 %v484_v1, %v494_v9  ;;  %vm135_vm7 = vmor %vm134_vm6, %vm133_vm5  ;;  %vm149_vm8 = vcmask 1043456   ;;  %s255_s4 = sshll.u32 %s444_s2, 4  ;;  %s445_s3 = smov [#allocation11]   ;;  %s256_s4 = int_to_ptr.vmem [resolvable:$true] %s255_s4 }
  0x14   :  { %v52_v18 = vstv %s51_s0  ;;  %s277_s16 = sshll.u32 %s445_s3, 4  ;;  %s279_s19 = sshll.u32 %s570_s5, 4  ;;  %s278_s16 = int_to_ptr.vmem [resolvable:$true] %s277_s16  ;;  %s280_s19 = int_to_ptr.hbm [resolvable:$true] %s279_s19 }
  0x15   :  { %v103_v16 = vmax.f32 %v79_v12, %v496_v10  ;;  %v104_v17 = vmax.f32 %v80_v13, %v498_v11  ;;  %v53_v19 = vmul.f32 %v52_v18, %v482_v0  ;;  %v54_v20 = vmul.f32 %v52_v18, %v484_v1 }
  0x16   :  { %v56_v21 = vstv %s299_s1  ;;  %v82_v26 = vstv %s302_s29  ;;  %v78_v12 = vadd.f32 %v494_v9, %v484_v1  ;;  %v77_v13 = vadd.f32 %v492_v8, %v482_v0 }
  0x17   :  { %v127_v22 = vmax.f32 %v103_v16, %v504_v14  ;;  %v128_v23 = vmax.f32 %v104_v17, %v506_v15  ;;  %v57_v24 = vmul.f32 %v56_v21, %v482_v0  ;;  %v58_v25 = vmul.f32 %v56_v21, %v484_v1 }
  0x18   :  { %v106_v27 = vstv %s305_s30  ;;  %v83_v32 = vmul.f32 %v82_v26, %v482_v0  ;;  %v84_v33 = vmul.f32 %v82_v26, %v484_v1  ;;  %v102_v16 = vadd.f32 %v498_v11, %v78_v12 }
  0x19   :  { %v237_v28 = vrot.slane %v127_v22, 2  ;;  %v238_v29 = vrot.slane %v128_v23, 2  ;;  %v300_v30 = vrot.slane %v57_v24, 9  ;;  %v301_v31 = vrot.slane %v58_v25, 9 }
  0x1a   :  { %v107_v34 = vmul.f32 %v106_v27, %v482_v0  ;;  %v108_v35 = vmul.f32 %v106_v27, %v484_v1  ;;  %v303_v41 = vrot.slane %v83_v32, 10  ;;  %v304_v42 = vrot.slane %v84_v33, 10 }
  0x1b   :  { %v239_v36 = vsel %vm171_vm1, %v127_v22, %v237_v28  ;;  %v240_v37 = vsel %vm171_vm1, %v128_v23, %v238_v29  ;;  %v67_v38 = vadd.f32 %v300_v30, %v53_v19  ;;  %v68_v39 = vadd.f32 %v301_v31, %v54_v20 }
  0x1c   :  { %v243_v40 = vrot.slane %v240_v37, 7  ;;  %v306_v43 = vrot.slane %v107_v34, 11  ;;  %v307_v44 = vrot.slane %v108_v35, 11  ;;  %v101_v18 = vadd.f32 %v496_v10, %v77_v13 }
  0x1d   :  { %v93_v46 = vadd.f32 %v303_v41, %v67_v38  ;;  %v94_v47 = vadd.f32 %v304_v42, %v68_v39  ;;  %v126_v19 = vadd.f32 %v506_v15, %v102_v16 }
  0x1e   :  { %v244_v45 = vsel %vm166_vm0, %v243_v40, %v239_v36  ;;  %v125_v23 = vadd.f32 %v504_v14, %v101_v18 }
  0x1f   :  { %v245_v48 = vsel %vm210_vm2, %v243_v40, %v244_v45  ;;  %v117_v51 = vadd.f32 %v306_v43, %v93_v46  ;;  %v118_v52 = vadd.f32 %v307_v44, %v94_v47  ;;  %v219_v24 = vmul.f32 0.25, %v126_v19 }
  0x20   :  { %v246_v50 = vsel %vm212_vm3, %v243_v40, %v245_v48  ;;  %v218_v27 = vmul.f32 0.25, %v125_v23 }
  0x21   :  { %v247_v53 = vsel %vm214_vm4, %v243_v40, %v246_v50  ;;  %v131_v54 = vadd.f32 %v130_v49, %v117_v51  ;;  %v132_v55 = vadd.f32 %v130_v49, %v118_v52  ;;  %v223_v1 = vrot.slane %v219_v24, 2 }
  0x22   :  { %249 = vst [vmem:[#allocation9] sm:$0xf] %v247_v53  ;;  %v222_v11 = vrot.slane %v218_v27, 2 }
  0x23   :  { %271 = dma.vmem_to_hbm [thread:$0]  %s267_s7, 64, %s269_s10, [#allocation10]   ;;  %v136_v56 = vsel %vm135_vm7, %v131_v54, -inf  ;;  %v137_v57 = vsel %vm135_vm7, %v132_v55, -inf  ;;  %v225_v15 = vsel %vm171_vm1, %v219_v24, %v223_v1 }
  0x24   :  { %v138_v58 = vmax.f32 %v136_v56, %v137_v57  ;;  %v228_v30 = vrot.slane %v225_v15, 7  ;;  %v224_v14 = vsel %vm171_vm1, %v218_v27, %v222_v11 }
  0x26   :  { %v140_v59 = vperm.slane %v138_v58, 0  ;;  %v141_v60 = vperm.slane %v138_v58, 4  ;;  %v229_v33 = vsel %vm166_vm0, %v228_v30, %v224_v14 }
  0x27   :  { %v230_v34 = vsel %vm210_vm2, %v228_v30, %v229_v33 }
  0x28   :  { %v144_v61 = vperm.slane %v140_v59, 0  ;;  %v145_v62 = vperm.slane %v141_v60, 0  ;;  %v231_v37 = vsel %vm212_vm3, %v228_v30, %v230_v34 }
  0x29   :  { %v232_v38 = vsel %vm214_vm4, %v228_v30, %v231_v37 }
  0x2a   :  { %v148_v63 = vrot.slane %v145_v62, 4  ;;  %234 = vst [vmem:[#allocation8] sm:$0xf] %v232_v38 }
  0x2b   :  { %260 = dma.vmem_to_hbm [thread:$0]  %s256_s4, 64, %s258_s15, [#allocation5]  }
  0x2c   :  { %v150_v2 = vsel %vm149_vm8, %v144_v61, %v148_v63 }
  0x2d   :  { %v151_v3 = vrot.slane %v150_v2, 1  ;;  %v154_v4 = vsub.f32 %v131_v54, %v150_v2 }
  0x2f   :  { %v155_v5 = vsub.f32 %v132_v55, %v151_v3  ;;  %v156_v6 = vmul.f32 1.442695, %v154_v4 }
  0x31   :  { %315 = vpow2.f32 %v156_v6  ;;  %v158_v7 = vmul.f32 1.442695, %v155_v5 }
  0x33   :  { %317 = vpow2.f32 %v158_v7 }
  0x37   :  { %v316_v17 = vpop.eup %315 }
  0x38   :  { %v162_v20 = vperm.slane %v316_v17, 0  ;;  %v163_v21 = vperm.slane %v316_v17, 4 }
  0x39   :  { %v318_v22 = vpop.eup %317 }
  0x3a   :  { %v164_v25 = vperm.slane %v318_v22, 0  ;;  %v165_v26 = vperm.slane %v318_v22, 4 }
  0x3c   :  { %v167_v9 = vsel %vm166_vm0, %v164_v25, %v162_v20  ;;  %v168_v0 = vsel %vm166_vm0, %v165_v26, %v163_v21 }
  0x3d   :  { %v172_v8 = vsel %vm171_vm1, %v167_v9, 0.0  ;;  %v179_v10 = vsel %vm171_vm1, %v168_v0, 0.0 }
  0x3e   :  { %v173_v28 = vrot.slane %v172_v8, 4  ;;  %v180_v29 = vrot.slane %v179_v10, 4 }
  0x40   :  { %v174_v31 = vadd.f32 %v173_v28, %v172_v8  ;;  %v181_v32 = vadd.f32 %v180_v29, %v179_v10 }
  0x42   :  { %v175_v35 = vrot.slane %v174_v31, 2  ;;  %v182_v36 = vrot.slane %v181_v32, 2 }
  0x44   :  { %v176_v39 = vadd.f32 %v175_v35, %v174_v31  ;;  %v183_v40 = vadd.f32 %v182_v36, %v181_v32 }
  0x46   :  { %v177_v41 = vrot.slane %v176_v39, 1  ;;  %v184_v42 = vrot.slane %v183_v40, 1 }
  0x48   :  { %v178_v43 = vadd.f32 %v177_v41, %v176_v39  ;;  %v185_v44 = vadd.f32 %v184_v42, %v183_v40 }
  0x4a   :  { %319 = vrcp.f32 %v178_v43 }
  0x4b   :  { %321 = vrcp.f32 %v185_v44 }
  0x50   :  { %v320_v45 = vpop.eup %319 }
  0x51   :  { %v322_v46 = vpop.eup %321  ;;  %v188_v47 = vperm.slane %v320_v45, 0 }
  0x52   :  { %v189_v48 = vperm.slane %v322_v46, 0 }
  0x54   :  { %v192_v49 = vrot.slane %v189_v48, 4 }
  0x56   :  { %v193_v50 = vsel %vm149_vm8, %v188_v47, %v192_v49 }
  0x57   :  { %v194_v51 = vrot.slane %v193_v50, 1  ;;  %v197_v52 = vmul.f32 %v316_v17, %v193_v50 }
  0x59   :  { %v198_v53 = vmul.f32 %v318_v22, %v194_v51  ;;  %v201_v54 = vrot.slane %v197_v52, 2 }
  0x5b   :  { %v202_v55 = vrot.slane %v198_v53, 2  ;;  %v203_v56 = vsel %vm171_vm1, %v197_v52, %v201_v54 }
  0x5d   :  { %v204_v57 = vsel %vm171_vm1, %v198_v53, %v202_v55 }
  0x5e   :  { %v208_v58 = vrot.slane %v204_v57, 7 }
  0x60   :  { %v209_v59 = vsel %vm166_vm0, %v208_v58, %v203_v56 }
  0x61   :  { %v211_v60 = vsel %vm210_vm2, %v208_v58, %v209_v59 }
  0x62   :  { %v213_v61 = vsel %vm212_vm3, %v208_v58, %v211_v60 }
  0x63   :  { %v215_v62 = vsel %vm214_vm4, %v208_v58, %v213_v61 }
  0x64   :  { %217 = vst [vmem:[#allocation11] sm:$0xf] %v215_v62 }
  0x65   :  { %282 = dma.vmem_to_hbm [thread:$0]  %s278_s16, 64, %s280_s19, [#allocation10]  }
  0x66   :  { %435 = dma.done.wait [#allocation5], 64  }
  0x67   :  { %436 = vsyncadd [#allocation5], 4294967232 }
  0x68   :  { %437 = dma.done.wait [#allocation10], 128  }
  0x69   :  { %438 = vsyncadd [#allocation10], 4294967168 }
  0x6a   :  { %295 = vsyncpa [#allocation4], 1 }
  0x6b   :  { %296 = vsyncpa [#allocation5], 1 }
  0x6c   :  { %297 = vsyncpa [#allocation10], 1 }
  0x6d   :  { %298 = vsyncpa [#allocation6], 1 }

</bundles_post_ra>
